<compile_context>
chip_gen: v7x
topology: tpu7x:2x2x1
jax: 0.10.0
libtpu: 0.0.40
codegen_flags: <defaults>
</compile_context>

<pallas_src>
import jax
import jax.numpy as jnp
from jax.experimental import pallas as pl
from jax.experimental.pallas import tpu as pltpu


_LANE = 512      # lane-dense last dim (4*128 -> unmasked vld/vst)
_MAX_TM = 2048   # row tile: 2048 x 512 f32 = 4 MiB per buffer


def _sine_kernel(w0_ref, x_ref, o_ref):
    # Pure VPU elementwise op: out = sin(w0 * x), computed in f32.
    w0 = w0_ref[0].astype(jnp.float32)
    x = x_ref[...].astype(jnp.float32)
    o_ref[...] = jnp.sin(w0 * x).astype(o_ref.dtype)


def _round_up(a, b):
    return ((a + b - 1) // b) * b


def sine_forward(x, w0):
    """Elementwise sin(w0 * x) for any input shape, via a Pallas TPU kernel."""
    orig_shape = x.shape
    n = x.size
    if n == 0:
        return x

    lane = _LANE
    # w0 lives in SMEM so a traced / learned w0 does not force a recompile.
    w0_arr = jnp.asarray(w0, dtype=jnp.float32).reshape((1,))

    padded = (n % lane) != 0
    if padded:
        # Unavoidable: pad only the flat tail to the next multiple of the lane
        # width (< 512 extra elements), never to a row-tile multiple.
        n_pad = _round_up(n, lane)
        rows = n_pad // lane
        xf = jnp.pad(jnp.ravel(x), (0, n_pad - n)).reshape(rows, lane)
    else:
        # Fast path: pure relayout, no extra HBM pass.
        rows = n // lane
        xf = x.reshape(rows, lane)

    if rows <= _MAX_TM:
        tm = rows        # single block == full array extent (always legal)
    else:
        tm = _MAX_TM     # multiple of 8/16/32 sublane packing
    num_blocks = pl.cdiv(rows, tm)   # partial last block is masked by Pallas

    out = pl.pallas_call(
        _sine_kernel,
        out_shape=jax.ShapeDtypeStruct((rows, lane), x.dtype),
        grid_spec=pltpu.PrefetchScalarGridSpec(
            num_scalar_prefetch=0,
            grid=(num_blocks,),
            in_specs=[
                pl.BlockSpec(memory_space=pltpu.MemorySpace.SMEM),   # w0 scalar
                pl.BlockSpec((tm, lane), lambda i: (i, 0)),
            ],
            out_specs=pl.BlockSpec((tm, lane), lambda i: (i, 0)),
        ),
        compiler_params=pltpu.CompilerParams(
            dimension_semantics=("parallel",),
            vmem_limit_bytes=32 * 1024 * 1024,
        ),
    )(w0_arr, xf)

    if padded:
        return out.reshape(-1)[:n].reshape(orig_shape)
    return out.reshape(orig_shape)


if __name__ == "__main__":
    key = jax.random.PRNGKey(0)
    w0 = 30.0

    # Fast (no-pad) path: numel = 2048 is a multiple of 512.
    x = jax.random.normal(key, (2, 4, 16, 16), dtype=jnp.float32)
    out = jax.block_until_ready(sine_forward(x, w0))
    ref = jnp.sin(w0 * x)
    assert out.shape == x.shape
    assert out.dtype == x.dtype
    assert jnp.allclose(out, ref, atol=1e-5, rtol=1e-5)

    # Padded-tail path: numel = 105 is not a multiple of 512.
    x2 = jax.random.normal(jax.random.PRNGKey(1), (3, 5, 7), dtype=jnp.float32)
    out2 = jax.block_until_ready(sine_forward(x2, w0))
    ref2 = jnp.sin(w0 * x2)
    assert out2.shape == x2.shape
    assert out2.dtype == x2.dtype
    assert jnp.allclose(out2, ref2, atol=1e-5, rtol=1e-5)

    print("KERNEL_OK")
</pallas_src>

<mosaic_0001>
module attributes {stable_mosaic.version = 11 : i64} {
  func.func @_sine_kernel(%arg0: i32, %arg1: memref<1xf32, #tpu.memory_space<smem>>, %arg2: memref<4x512xf32, #tpu.memory_space<vmem>>, %arg3: memref<4x512xf32, #tpu.memory_space<vmem>>) attributes {dimension_semantics = [#tpu.dimension_semantics<parallel>], iteration_bounds = array<i64: 1>, scalar_prefetch = 0 : i64, scratch_operands = 0 : i64, tpu.core_type = #tpu.core_type<tc>, window_params = [{transform_indices = @transform_0, window_bounds = array<i64: 1>}, {transform_indices = @transform_1, window_bounds = array<i64: 4, 512>}, {transform_indices = @transform_2, window_bounds = array<i64: 4, 512>}]} {
    %c0 = arith.constant 0 : index
    %0 = memref.load %arg1[%c0] : memref<1xf32, #tpu.memory_space<smem>>
    %c0_0 = arith.constant 0 : index
    %c0_1 = arith.constant 0 : index
    %1 = vector.load %arg2[%c0_0, %c0_1] : memref<4x512xf32, #tpu.memory_space<vmem>>, vector<4x512xf32>
    %2 = vector.broadcast %0 : f32 to vector<4x512xf32>
    %3 = arith.mulf %2, %1 : vector<4x512xf32>
    %4 = math.sin %3 : vector<4x512xf32>
    %c0_2 = arith.constant 0 : index
    %c0_3 = arith.constant 0 : index
    %5 = vector.load %arg3[%c0_2, %c0_3] : memref<4x512xf32, #tpu.memory_space<vmem>>, vector<4x512xf32>
    tpu.vector_store %arg3[%c0_2, %c0_3], %4 {strides = array<i32>} : memref<4x512xf32, #tpu.memory_space<vmem>>, vector<4x512xf32>,
    return
  }
  func.func @transform_0(%arg0: i32) -> i32 {
    %c0_i32 = arith.constant 0 : i32
    %c0_i32_0 = arith.constant 0 : i32
    return %c0_i32 : i32
  }
  func.func @transform_1(%arg0: i32) -> (i32, i32) {
    %c0_i32 = arith.constant 0 : i32
    %c0_i32_0 = arith.constant 0 : i32
    return %arg0, %c0_i32 : i32, i32
  }
  func.func @transform_2(%arg0: i32) -> (i32, i32) {
    %c0_i32 = arith.constant 0 : i32
    %c0_i32_0 = arith.constant 0 : i32
    return %arg0, %c0_i32 : i32, i32
  }
}

</mosaic_0001>

<bundles_post_ra>
// kernel: tpu_custom_call.1
= control target key start
LH: loop header
LB: loop body
LE: loop exit
PB: predicated region body
PF: predicated region fallthrough
CT: control target
= control target key end

     0   :  { %8 = vsyncpa [#allocation4], 0  ;;  %s456_s0 = inlined_call_operand.<no memory space> [shape: f32[1], index: 0, kind: input, shape index: {}]   ;;  %s457_s1 = inlined_call_operand.hbm [shape: f32[4,512], index: 1, kind: input, shape index: {}]   ;;  %s458_s2 = inlined_call_operand.hbm [shape: f32[4,512], index: 2, kind: output, shape index: {}]  }
   0x1   :  { %9 = vsyncpa [#allocation5], 0  ;;  %s336_s9 = smov [#allocation3]   ;;  %s288_s13 = scalar_lea.hbm %s457_s1, 256 }
   0x2   :  { %s18_s10 = sshll.u32 %s336_s9, 4  ;;  %p289_p0 = scmp.ne.s32.totalorder %s457_s1, %s288_s13  ;;  %s19_s10 = int_to_ptr.vmem [resolvable:$true] %s18_s10 }
   0x3   :  { %p292_p1 = scmp.lt.u32.totalorder %s288_s13, %s457_s1 }
   0x5   :  { %p294_p2 = pnand %p292_p1, %p289_p0 }
   0x7   :  { %297 = shalt.err (!%p294_p2)
}
   0x8   :  { %s298_s18 = scalar_lea.vmem %s19_s10, 256  ;;  %p303_p4 = scmp.lt.s32.totalorder %s19_s10, %s19_s10 }
   0x9   :  { %p299_p3 = scmp.ne.s32.totalorder %s19_s10, %s298_s18  ;;  %p304_p5 = scmp.lt.s32.totalorder %s298_s18, %s298_s18 }
   0xb   :  { %p305_p6 = por %p304_p5, %p303_p4 }
   0xd   :  { %p306_p7 = pnand %p305_p6, %p299_p3 }
   0xf   :  { %309 = shalt.err (!%p306_p7)
}
  0x10   :  { %21 = dma.hbm_to_vmem [thread:$0]  %s457_s1, 256, %s19_s10, [#allocation4]  }
  0x11   :  { %332 = dma.done.wait [#allocation4], 256  }
  0x12   :  { %333 = vsyncadd [#allocation4], 4294967040  ;;  %v28_v0 = vstv %s456_s0  ;;  %v26_v1 = vld [vmem:[#allocation3] sm:$0xff]  ;;  %v27_v2 = vld [vmem:[#allocation3 + $0x8] sm:$0xff]  ;;  %v337_v27 = vmov 683565275  }
  0x13   :  { %v374_v3 = vmul.f32 %v28_v0, %v26_v1  ;;  %v376_v4 = vmul.f32 %v28_v0, %v27_v2  ;;  %v338_v29 = vmov 2475754826   ;;  %v339_v31 = vmov 2131351028   ;;  %s343_s0 = smov [#allocation6]  }
  0x14   :  { %v340_v33 = vmov 2102212464   ;;  %v341_v35 = vmov 920167782   ;;  %v342_v43 = vmov 1326507024  }
  0x15   :  { %v31_v5 = vand.u32 2147483647, %v374_v3  ;;  %v34_v6 = vand.u32 2139095040, %v374_v3  ;;  %v135_v7 = vand.u32 2147483647, %v376_v4  ;;  %v138_v8 = vand.u32 2139095040, %v376_v4 }
  0x16   :  { %vm33_vm14 = vcmp.lt.s32.totalorder %v374_v3, 0  ;;  %s247_s1 = sshll.u32 %s343_s0, 4  ;;  %s248_s1 = int_to_ptr.vmem [resolvable:$true] %s247_s1 }
  0x17   :  { %v35_v9 = vshrl.u32 %v34_v6, 23  ;;  %v38_v10 = vand.u32 8388607, %v31_v5  ;;  %v139_v11 = vshrl.u32 %v138_v8, 23  ;;  %v142_v12 = vand.u32 8388607, %v135_v7  ;;  %p315_p9 = scmp.lt.s32.totalorder %s248_s1, %s248_s1 }
  0x18   :  { %vm32_vm15 = vcmp.le.f32.partialorder %v31_v5, 0.7853982  ;;  %s310_s23 = scalar_lea.vmem %s248_s1, 256 }
  0x19   :  { %v256_v13 = vadd.s32 4294967169, %v35_v9  ;;  %v260_v14 = vadd.s32 4294967169, %v139_v11  ;;  %v39_v16 = vor.u32 8388608, %v38_v10  ;;  %v143_v17 = vor.u32 8388608, %v142_v12  ;;  %p311_p8 = scmp.ne.s32.totalorder %s248_s1, %s310_s23  ;;  %p316_p10 = scmp.lt.s32.totalorder %s310_s23, %s310_s23 }
  0x1b   :  { %v41_v15 = vadd.s32 1, %v256_v13  ;;  %v145_v18 = vadd.s32 1, %v260_v14  ;;  %v386_v23 = vshll.u32 %v39_v16, 8  ;;  %v388_v25 = vshll.u32 %v143_v17, 8  ;;  %p317_p11 = por %p316_p10, %p315_p9 }
  0x1d   :  { %vm42_vm0 = vcmp.gt.s32.totalorder %v41_v15, 0  ;;  %vm146_vm1 = vcmp.gt.s32.totalorder %v145_v18, 0  ;;  %p318_p12 = pnand %p317_p11, %p311_p8 }
  0x1e   :  { %v43_v19 = vsel %vm42_vm0, %v41_v15, 0  ;;  %v147_v22 = vsel %vm146_vm1, %v145_v18, 0  ;;  %vm137_vm0 = vcmp.lt.s32.totalorder %v376_v4, 0  ;;  %vm136_vm1 = vcmp.le.f32.partialorder %v135_v7, 0.7853982 }
  0x1f   :  { %v44_v20 = vshrl.u32 %v43_v19, 5  ;;  %v45_v21 = vand.u32 31, %v43_v19  ;;  %v149_v24 = vand.u32 31, %v147_v22  ;;  %v390_v37 = vshrl.u32 %v147_v22, 5 }
  0x21   :  { %v46_v26 = vsub.s32 32, %v45_v21  ;;  %v48_v28 = vshll.u32 %v337_v27, %v45_v21  ;;  %v51_v30 = vshll.u32 %v338_v29, %v45_v21  ;;  %v54_v32 = vshll.u32 %v339_v31, %v45_v21 }
  0x22   :  { %v57_v34 = vshll.u32 %v340_v33, %v45_v21  ;;  %v60_v36 = vshll.u32 %v341_v35, %v45_v21  ;;  %vm63_vm2 = vcmp.lt.s32.totalorder %v44_v20, 1  ;;  %vm64_vm3 = vcmp.lt.s32.totalorder %v44_v20, 2 }
  0x23   :  { %v47_v38 = vshrl.u32 %v337_v27, %v46_v26  ;;  %v49_v39 = vshrl.u32 %v338_v29, %v46_v26  ;;  %v52_v40 = vshrl.u32 %v339_v31, %v46_v26  ;;  %v55_v41 = vshrl.u32 %v340_v33, %v46_v26 }
  0x24   :  { %v58_v42 = vshrl.u32 %v341_v35, %v46_v26  ;;  %v61_v44 = vshrl.u32 %v342_v43, %v46_v26  ;;  %vm66_vm4 = vcmp.lt.s32.totalorder %v44_v20, 4  ;;  %v150_v48 = vsub.s32 32, %v149_v24 }
  0x25   :  { %v50_v45 = vor.u32 %v49_v39, %v48_v28  ;;  %v53_v46 = vor.u32 %v52_v40, %v51_v30  ;;  %v56_v47 = vor.u32 %v55_v41, %v54_v32  ;;  %vm65_vm5 = vcmp.lt.s32.totalorder %v44_v20, 3 }
  0x26   :  { %v59_v49 = vor.u32 %v58_v42, %v57_v34  ;;  %v62_v50 = vor.u32 %v61_v44, %v60_v36  ;;  %v152_v51 = vshll.u32 %v337_v27, %v149_v24  ;;  %v155_v59 = vshll.u32 %v338_v29, %v149_v24 }
  0x27   :  { %v67_v52 = vsel %vm63_vm2, %v47_v38, %v50_v45  ;;  %v68_v53 = vsel %vm66_vm4, %v56_v47, 2102212464  ;;  %v71_v54 = vsel %vm63_vm2, %v50_v45, %v53_v46  ;;  %v75_v55 = vsel %vm63_vm2, %v53_v46, %v56_v47 }
  0x28   :  { %v69_v56 = vsel %vm65_vm5, %v53_v46, %v68_v53  ;;  %v72_v57 = vsel %vm66_vm4, %v59_v49, 920167782  ;;  %v76_v58 = vsel %vm66_vm4, %v62_v50, 1326507024  ;;  %v151_v62 = vshrl.u32 %v337_v27, %v150_v48 }
  0x29   :  { %v73_v60 = vsel %vm65_vm5, %v56_v47, %v72_v57  ;;  %v77_v61 = vsel %vm65_vm5, %v59_v49, %v76_v58  ;;  %v153_v63 = vshrl.u32 %v338_v29, %v150_v48  ;;  %v70_v0 = vsel %vm64_vm3, %v67_v52, %v69_v56 }
  0x2a   :  { %v74_v1 = vsel %vm64_vm3, %v71_v54, %v73_v60  ;;  %v78_v2 = vsel %vm64_vm3, %v75_v55, %v77_v61  ;;  %v156_v6 = vshrl.u32 %v339_v31, %v150_v48  ;;  %v158_v14 = vshll.u32 %v339_v31, %v149_v24 }
  0x2b   :  { %v399_v8 = vmul.u32.u64.low %v386_v23, %v78_v2  ;;  %v400_v9 = vmul.u32.u64.high %v386_v23, %v78_v2, %v399_v8  ;;  %v403_v10 = vmul.u32.u64.low %v386_v23, %v74_v1  ;;  %v404_v11 = vmul.u32.u64.high %v386_v23, %v74_v1, %v403_v10 }
  0x2c   :  { %v154_v12 = vor.u32 %v153_v63, %v152_v51  ;;  %v157_v13 = vor.u32 %v156_v6, %v155_v59  ;;  %v159_v15 = vshrl.u32 %v340_v33, %v150_v48  ;;  %v161_v16 = vshll.u32 %v340_v33, %v149_v24 }
  0x2d   :  { %v162_v17 = vshrl.u32 %v341_v35, %v150_v48  ;;  %v164_v18 = vshll.u32 %v341_v35, %v149_v24  ;;  %v165_v19 = vshrl.u32 %v342_v43, %v150_v48  ;;  %v86_v20 = vmul.u32 %v386_v23, %v70_v0 }
  0x2e   :  { %v160_v21 = vor.u32 %v159_v15, %v158_v14  ;;  %vm167_vm6 = vcmp.lt.s32.totalorder %v390_v37, 1  ;;  %vm168_vm7 = vcmp.lt.s32.totalorder %v390_v37, 2  ;;  %vm88_vm8 = vc.u32 %v400_v9, %v403_v10 }
  0x2f   :  { %v89_v22 = vadd.s32 1, %v404_v11  ;;  %v163_v26 = vor.u32 %v162_v17, %v161_v16  ;;  %vm169_vm9 = vcmp.lt.s32.totalorder %v390_v37, 3  ;;  %v166_v27 = vor.u32 %v165_v19, %v164_v18 }
  0x30   :  { %vm170_vm10 = vcmp.lt.s32.totalorder %v390_v37, 4  ;;  %v171_v28 = vsel %vm167_vm6, %v151_v62, %v154_v12  ;;  %v175_v24 = vsel %vm167_vm6, %v154_v12, %v157_v13  ;;  %v179_v31 = vsel %vm167_vm6, %v157_v13, %v160_v21 }
  0x31   :  { %v90_v29 = vsel %vm88_vm8, %v89_v22, %v404_v11  ;;  %v172_v23 = vsel %vm170_vm10, %v160_v21, 2102212464  ;;  %v176_v30 = vsel %vm170_vm10, %v163_v26, 920167782  ;;  %v180_v35 = vsel %vm170_vm10, %v166_v27, 1326507024 }
  0x32   :  { %v91_v32 = vadd.s32 %v90_v29, %v86_v20  ;;  %v173_v33 = vsel %vm169_vm9, %v157_v13, %v172_v23  ;;  %v177_v34 = vsel %vm169_vm9, %v160_v21, %v176_v30  ;;  %v181_v39 = vsel %vm169_vm9, %v163_v26, %v180_v35 }
  0x33   :  { %v174_v36 = vsel %vm168_vm7, %v171_v28, %v173_v33  ;;  %v178_v38 = vsel %vm168_vm7, %v175_v24, %v177_v34  ;;  %v182_v41 = vsel %vm168_vm7, %v179_v31, %v181_v39  ;;  %v87_v60 = vadd.s32 %v403_v10, %v400_v9 }
  0x34   :  { %v92_v40 = vadd.s32 536870912, %v91_v32  ;;  %v421_v42 = vmul.u32.u64.low %v388_v25, %v178_v38  ;;  %v422_v43 = vmul.u32.u64.high %v388_v25, %v178_v38, %v421_v42  ;;  %v190_v47 = vmul.u32 %v388_v25, %v174_v36 }
  0x35   :  { %v425_v44 = vmul.u32.u64.low %v388_v25, %v182_v41  ;;  %v426_v45 = vmul.u32.u64.high %v388_v25, %v182_v41, %v425_v44  ;;  %vm123_vm5 = vweird.f32 %v374_v3  ;;  %vm227_vm9 = vweird.f32 %v376_v4 }
  0x36   :  { %v93_v46 = vshrl.u32 %v92_v40, 30  ;;  %v193_v49 = vadd.s32 1, %v422_v43 }
  0x37   :  { %vm192_vm11 = vc.u32 %v426_v45, %v421_v42  ;;  %v191_v16 = vadd.s32 %v421_v42, %v426_v45 }
  0x38   :  { %v94_v48 = vshll.u32 %v93_v46, 30  ;;  %v194_v37 = vsel %vm192_vm11, %v193_v49, %v422_v43  ;;  %v117_v9 = vsub.s32 4, %v93_v46 }
  0x39   :  { %v195_v51 = vadd.s32 %v194_v37, %v190_v47 }
  0x3a   :  { %v95_v50 = vsub.s32 %v91_v32, %v94_v48  ;;  %v118_v28 = vsel %vm33_vm14, %v117_v9, %v93_v46 }
  0x3b   :  { %v196_v53 = vadd.s32 536870912, %v195_v51  ;;  %v120_v31 = vsel %vm32_vm15, 0, %v118_v28 }
  0x3c   :  { %v97_v52 = vsub.s32 0, %v95_v50  ;;  %v124_v36 = vadd.s32 3, %v120_v31 }
  0x3d   :  { %v197_v55 = vshrl.u32 %v196_v53, 30 }
  0x3e   :  { %v257_v54 = vmin.u32 %v97_v52, %v95_v50  ;;  %v125_v40 = vand.u32 3, %v124_v36 }
  0x3f   :  { %v198_v57 = vshll.u32 %v197_v55, 30  ;;  %v221_v35 = vsub.s32 4, %v197_v55 }
  0x40   :  { %v99_v56 = vclz %v257_v54  ;;  %vm130_vm2 = vcmp.eq.s32.totalorder %v125_v40, 2  ;;  %vm127_vm3 = vcmp.eq.s32.totalorder %v125_v40, 0  ;;  %vm126_vm4 = vcmp.lt.s32.totalorder %v125_v40, 2 }
  0x41   :  { %v199_v59 = vsub.s32 %v195_v51, %v198_v57  ;;  %v222_v39 = vsel %vm137_vm0, %v221_v35, %v197_v55 }
  0x42   :  { %v258_v58 = vadd.s32 4294967294, %v99_v56  ;;  %v224_v43 = vsel %vm136_vm1, 0, %v222_v39 }
  0x43   :  { %v201_v61 = vsub.s32 0, %v199_v59  ;;  %v228_v47 = vadd.s32 3, %v224_v43 }
  0x44   :  { %vm259_vm12 = vcmp.lt.s32.totalorder %v258_v58, 0 }
  0x45   :  { %v102_v25 = vsel %vm259_vm12, 0, %v258_v58  ;;  %v261_v1 = vmin.u32 %v201_v61, %v199_v59  ;;  %v229_v37 = vand.u32 3, %v228_v47 }
  0x46   :  { %v103_v62 = vsub.s32 32, %v102_v25  ;;  %v104_v63 = vshll.u32 %v95_v50, %v102_v25  ;;  %v107_v0 = vsub.s32 4294967266, %v102_v25 }
  0x47   :  { %v203_v8 = vclz %v261_v1  ;;  %vm234_vm6 = vcmp.eq.s32.totalorder %v229_v37, 2  ;;  %vm231_vm7 = vcmp.eq.s32.totalorder %v229_v37, 0  ;;  %vm230_vm8 = vcmp.lt.s32.totalorder %v229_v37, 2 }
  0x48   :  { %v105_v2 = vshrl.u32 %v87_v60, %v103_v62  ;;  %v108_v6 = vadd.s32 127, %v107_v0 }
  0x49   :  { %v262_v13 = vadd.s32 4294967294, %v203_v8 }
  0x4a   :  { %v106_v11 = vor.u32 %v105_v2, %v104_v63  ;;  %v109_v12 = vshll.u32 %v108_v6, 23 }
  0x4b   :  { %vm263_vm13 = vcmp.lt.s32.totalorder %v262_v13, 0 }
  0x4c   :  { %v110_v14 = vor.u32 4788187, %v109_v12  ;;  %v113_v15 = vcvt.s32.f32 %v106_v11  ;;  %v206_v10 = vsel %vm263_vm13, 0, %v262_v13 }
  0x4d   :  { %v207_v18 = vsub.s32 32, %v206_v10  ;;  %v208_v19 = vshll.u32 %v199_v59, %v206_v10  ;;  %v211_v20 = vsub.s32 4294967266, %v206_v10 }
  0x4e   :  { %v111_v17 = vand.u32 2147483647, %v110_v14 }
  0x4f   :  { %v209_v22 = vshrl.u32 %v191_v16, %v207_v18  ;;  %v212_v26 = vadd.s32 127, %v211_v20 }
  0x50   :  { %v114_v21 = vmul.f32 %v113_v15, %v111_v17 }
  0x51   :  { %v210_v24 = vor.u32 %v209_v22, %v208_v19  ;;  %v213_v29 = vshll.u32 %v212_v26, 23 }
  0x52   :  { %v115_v27 = vxor.u32 2147483648, %v114_v21 }
  0x53   :  { %v214_v32 = vor.u32 4788187, %v213_v29  ;;  %v217_v33 = vcvt.s32.f32 %v210_v24 }
  0x54   :  { %v116_v23 = vsel %vm33_vm14, %v115_v27, %v114_v21 }
  0x55   :  { %v119_v30 = vsel %vm32_vm15, %v374_v3, %v116_v23  ;;  %v215_v34 = vand.u32 2147483647, %v214_v32 }
  0x56   :  { %280 = vcosq.f32 %v119_v30 }
  0x57   :  { %282 = vsinq.f32 %v119_v30  ;;  %v218_v38 = vmul.f32 %v217_v33, %v215_v34 }
  0x59   :  { %v219_v5 = vxor.u32 2147483648, %v218_v38 }
  0x5b   :  { %v220_v41 = vsel %vm137_vm0, %v219_v5, %v218_v38 }
  0x5c   :  { %v223_v42 = vsel %vm136_vm1, %v376_v4, %v220_v41 }
  0x5d   :  { %284 = vcosq.f32 %v223_v42 }
  0x5e   :  { %286 = vsinq.f32 %v223_v42 }
  0x60   :  { %v281_v44 = vpop.eup %280 }
  0x61   :  { %v283_v45 = vpop.eup %282  ;;  %v131_v46 = vxor.u32 2147483648, %v281_v44 }
  0x62   :  { %v128_v48 = vxor.u32 2147483648, %v283_v45 }
  0x63   :  { %v132_v7 = vsel %vm130_vm2, %v131_v46, %v283_v45 }
  0x64   :  { %v129_v49 = vsel %vm127_vm3, %v281_v44, %v128_v48 }
  0x65   :  { %v133_v50 = vsel %vm126_vm4, %v129_v49, %v132_v7 }
  0x66   :  { %v134_v51 = vsel %vm123_vm5, nan, %v133_v50 }
  0x67   :  { %239 = vst [vmem:[#allocation6] sm:$0xff] %v134_v51  ;;  %v285_v52 = vpop.eup %284 }
  0x68   :  { %v287_v53 = vpop.eup %286  ;;  %v235_v54 = vxor.u32 2147483648, %v285_v52 }
  0x69   :  { %v232_v55 = vxor.u32 2147483648, %v287_v53 }
  0x6a   :  { %v236_v56 = vsel %vm234_vm6, %v235_v54, %v287_v53 }
  0x6b   :  { %v233_v57 = vsel %vm231_vm7, %v285_v52, %v232_v55 }
  0x6c   :  { %v237_v3 = vsel %vm230_vm8, %v233_v57, %v236_v56 }
  0x6d   :  { %v238_v58 = vsel %vm227_vm9, nan, %v237_v3 }
  0x6e   :  { %240 = vst [vmem:[#allocation6 + $0x8] sm:$0xff] %v238_v58 }
  0x6f   :  { %321 = shalt.err (!%p318_p12)
}
  0x70   :  { %s322_s26 = scalar_lea.hbm %s458_s2, 256 }
  0x71   :  { %p323_p13 = scmp.ne.s32.totalorder %s458_s2, %s322_s26  ;;  %p326_p0 = scmp.lt.u32.totalorder %s322_s26, %s458_s2 }
  0x73   :  { %p328_p1 = pnand %p326_p0, %p323_p13 }
  0x75   :  { %331 = shalt.err (!%p328_p1)
}
  0x76   :  { %250 = dma.vmem_to_hbm [thread:$0]  %s248_s1, 256, %s458_s2, [#allocation5]  }
  0x77   :  { %334 = dma.done.wait [#allocation5], 256  }
  0x78   :  { %335 = vsyncadd [#allocation5], 4294967040 }
  0x79   :  { %254 = vsyncpa [#allocation4], 1 }
  0x7a   :  { %255 = vsyncpa [#allocation5], 1 }

</bundles_post_ra>
